<compile_context>
chip_gen: v6e
topology: v6e:2x2x1
jax: 0.10.0
libtpu: 0.0.40
codegen_flags: <defaults>
</compile_context>

<pallas_src>
import functools

import jax
import jax.numpy as jnp
from jax.experimental import pallas as pl
from jax.experimental.pallas import tpu as pltpu

_LANE = 128      # vreg lane width
_SUBLANE = 8     # f32 sublane tile


def _round_up(n, m):
    return (n + m - 1) // m * m


def _vmem_cap_bytes():
    """~75% of physical per-core VMEM (v5e/v6e: 128 MiB, v7x: 64 MiB)."""
    try:
        cap = int(pltpu.get_tpu_info().vmem_capacity_bytes)
    except Exception:
        cap = 64 << 20
    return (cap * 3) // 4


def _reward_kernel(x_ref, w1_ref, b1_ref, w2_ref, b2_ref, o_ref):
    # Layer 1: Linear + ReLU.  f32 MXU operands, f32 accumulation (mem-bound =>
    # the extra MXU passes for f32 are free; keeps numerics near the f32 reference).
    h = jnp.dot(x_ref[...], w1_ref[...], preferred_element_type=jnp.float32)
    h = jnp.maximum(h + b1_ref[...], 0.0)                 # (TB, Hp) + (1, Hp)

    # Layer 2: Linear + bias + Sigmoid (sigmoid goes to the EUP slot).
    y = jnp.dot(h, w2_ref[...], preferred_element_type=jnp.float32)
    o_ref[...] = jax.nn.sigmoid(y + b2_ref[...]).astype(o_ref.dtype)


@functools.partial(jax.jit, static_argnames=("block_b",))
def reward_forward(x, w1, b1, w2, b2, *, block_b=1024):
    """Pallas forward pass of the Reward MLP.

    x : (B, input_size) float32
    w1: (input_size, hidden_size), b1: (hidden_size,)
    w2: (hidden_size, output_size), b2: (output_size,)
    returns (B, output_size) float32
    """
    B, I = x.shape
    H = w1.shape[1]
    O = w2.shape[1]

    # Only the VMEM-internal hidden dim gets lane padding; x / out stay unpadded.
    Hp = _round_up(H, _LANE)

    x = x.astype(jnp.float32)
    w1_p = jnp.pad(w1.astype(jnp.float32), ((0, 0), (0, Hp - H)))
    b1_p = jnp.pad(b1.astype(jnp.float32), (0, Hp - H)).reshape(1, Hp)
    w2_p = jnp.pad(w2.astype(jnp.float32), ((0, Hp - H), (0, 0)))
    b2_p = b2.astype(jnp.float32).reshape(1, O)

    # Batch tile: multiple of 8 sublanes; prefer >= 2 grid steps so the "parallel"
    # batch axis can shard across both v7x TensorCores (no cost on v5e/v6e).
    TB = _round_up(min(block_b, _round_up(B, _SUBLANE)), _SUBLANE)
    if B > _SUBLANE:
        TB = min(TB, _round_up(pl.cdiv(B, 2), _SUBLANE))

    # Resident (constant index_map) operands: single-buffer only when large —
    # default double-buffering of resident weights just doubles VMEM for nothing.
    resident_bytes = (I * Hp + Hp * O + Hp + O) * 4
    single_buffer_weights = resident_bytes > (8 << 20)
    wbuf = 1 if single_buffer_weights else 2
    w_kwargs = dict(pipeline_mode=pl.Buffered(1)) if single_buffer_weights else {}

    cap = _vmem_cap_bytes()

    def vmem_need(tb):
        return int(2 * tb * (I + O) * 4          # double-buffered x / out tiles
                   + wbuf * resident_bytes       # resident weights + biases
                   + tb * Hp * 4                 # hidden activations
                   + (4 << 20))                  # headroom

    # If the tile doesn't fit the VMEM cap, shrink TB rather than silently clamping.
    while vmem_need(TB) > cap and TB > _SUBLANE:
        TB = _round_up(TB // 2, _SUBLANE)
    vmem_bytes = int(min(max(vmem_need(TB), 32 << 20), cap))

    grid = (pl.cdiv(B, TB),)   # ragged last block handled by Pallas

    cost = pl.CostEstimate(
        flops=2 * B * (I * Hp + Hp * O),
        transcendentals=B * O,
        bytes_accessed=int(x.size * 4 + w1_p.size * 4 + w2_p.size * 4
                           + b1_p.size * 4 + b2_p.size * 4 + B * O * 4),
    )

    return pl.pallas_call(
        _reward_kernel,
        out_shape=jax.ShapeDtypeStruct((B, O), jnp.float32),
        grid_spec=pltpu.PrefetchScalarGridSpec(
            num_scalar_prefetch=0,
            grid=grid,
            in_specs=[
                pl.BlockSpec((TB, I), lambda i: (i, 0)),               # x: batch-tiled
                pl.BlockSpec((I, Hp), lambda i: (0, 0), **w_kwargs),   # W1: resident
                pl.BlockSpec((1, Hp), lambda i: (0, 0), **w_kwargs),   # b1: resident
                pl.BlockSpec((Hp, O), lambda i: (0, 0), **w_kwargs),   # W2: resident
                pl.BlockSpec((1, O), lambda i: (0, 0), **w_kwargs),    # b2: resident
            ],
            out_specs=pl.BlockSpec((TB, O), lambda i: (i, 0)),
        ),
        compiler_params=pltpu.CompilerParams(
            dimension_semantics=("parallel",),
            vmem_limit_bytes=vmem_bytes,
        ),
        cost_estimate=cost,
    )(x, w1_p, b1_p, w2_p, b2_p)


def init_reward_params(key, input_size, hidden_size, output_size):
    """Deterministic init mimicking nn.Linear (uniform +-1/sqrt(fan_in))."""
    k1, k2, k3, k4 = jax.random.split(key, 4)
    bound1 = 1.0 / jnp.sqrt(input_size)
    bound2 = 1.0 / jnp.sqrt(hidden_size)
    w1 = jax.random.uniform(k1, (input_size, hidden_size), jnp.float32,
                            -bound1, bound1)
    b1 = jax.random.uniform(k2, (hidden_size,), jnp.float32, -bound1, bound1)
    w2 = jax.random.uniform(k3, (hidden_size, output_size), jnp.float32,
                            -bound2, bound2)
    b2 = jax.random.uniform(k4, (output_size,), jnp.float32, -bound2, bound2)
    return w1, b1, w2, b2


def reward_reference(x, w1, b1, w2, b2):
    """Pure-JAX f32 reference for correctness check."""
    h = jnp.maximum(x @ w1 + b1, 0.0)
    return jax.nn.sigmoid(h @ w2 + b2)


if __name__ == "__main__":
    key = jax.random.PRNGKey(0)
    kx, kx2, kp = jax.random.split(key, 3)

    input_size = 32
    hidden_size = 64
    output_size = 16
    w1, b1, w2, b2 = init_reward_params(kp, input_size, hidden_size, output_size)

    # Small batch (single grid step).
    batch = 8
    x = jax.random.normal(kx, (batch, input_size), dtype=jnp.float32)
    out = jax.block_until_ready(reward_forward(x, w1, b1, w2, b2))
    ref = reward_reference(x, w1, b1, w2, b2)
    assert out.shape == (batch, output_size)
    assert jnp.allclose(out, ref, atol=1e-2, rtol=1e-2), "mismatch vs reference (B=8)"

    # Non-multiple batch -> multi-step grid with a ragged last block.
    batch2 = 300
    x2 = jax.random.normal(kx2, (batch2, input_size), dtype=jnp.float32)
    out2 = jax.block_until_ready(reward_forward(x2, w1, b1, w2, b2, block_b=128))
    ref2 = reward_reference(x2, w1, b1, w2, b2)
    assert out2.shape == (batch2, output_size)
    assert jnp.allclose(out2, ref2, atol=1e-2, rtol=1e-2), "mismatch vs reference (B=300)"

    print("KERNEL_OK")
</pallas_src>

<mosaic_0001>
module attributes {stable_mosaic.version = 11 : i64} {
  func.func @_reward_kernel(%arg0: i32, %arg1: memref<8x32xf32, #tpu.memory_space<vmem>>, %arg2: memref<32x128xf32, #tpu.memory_space<vmem>>, %arg3: memref<1x128xf32, #tpu.memory_space<vmem>>, %arg4: memref<128x16xf32, #tpu.memory_space<vmem>>, %arg5: memref<1x16xf32, #tpu.memory_space<vmem>>, %arg6: memref<8x16xf32, #tpu.memory_space<vmem>>) attributes {dimension_semantics = [#tpu.dimension_semantics<parallel>], iteration_bounds = array<i64: 1>, scalar_prefetch = 0 : i64, scratch_operands = 0 : i64, tpu.core_type = #tpu.core_type<tc>, window_params = [{transform_indices = @transform_0, window_bounds = array<i64: 8, 32>}, {pipeline_mode = #tpu.pipeline_mode<synchronous>, transform_indices = @transform_1, window_bounds = array<i64: 32, 128>}, {pipeline_mode = #tpu.pipeline_mode<synchronous>, transform_indices = @transform_2, window_bounds = array<i64: 1, 128>}, {pipeline_mode = #tpu.pipeline_mode<synchronous>, transform_indices = @transform_3, window_bounds = array<i64: 128, 16>}, {pipeline_mode = #tpu.pipeline_mode<synchronous>, transform_indices = @transform_4, window_bounds = array<i64: 1, 16>}, {transform_indices = @transform_5, window_bounds = array<i64: 8, 16>}]} {
    %c0 = arith.constant 0 : index
    %c0_0 = arith.constant 0 : index
    %0 = vector.load %arg1[%c0, %c0_0] : memref<8x32xf32, #tpu.memory_space<vmem>>, vector<8x32xf32>
    %c0_1 = arith.constant 0 : index
    %c0_2 = arith.constant 0 : index
    %1 = vector.load %arg2[%c0_1, %c0_2] : memref<32x128xf32, #tpu.memory_space<vmem>>, vector<32x128xf32>
    %cst = arith.constant dense<0.000000e+00> : vector<8x128xf32>
    %2 = tpu.matmul %0, %1, %cst {dimension_numbers = #tpu.dot_dimension_numbers<[1], [0], [0], [1], [0, 0, 1, 1], [], []>} : vector<8x32xf32>, vector<32x128xf32>, vector<8x128xf32> -> vector<8x128xf32>
    %c0_3 = arith.constant 0 : index
    %c0_4 = arith.constant 0 : index
    %3 = vector.load %arg3[%c0_3, %c0_4] : memref<1x128xf32, #tpu.memory_space<vmem>>, vector<1x128xf32>
    %4 = vector.broadcast %3 : vector<1x128xf32> to vector<8x128xf32>
    %5 = arith.addf %2, %4 : vector<8x128xf32>
    %cst_5 = arith.constant 0.000000e+00 : f32
    %6 = vector.broadcast %cst_5 : f32 to vector<8x128xf32>
    %7 = arith.maximumf %5, %6 : vector<8x128xf32>
    %c0_6 = arith.constant 0 : index
    %c0_7 = arith.constant 0 : index
    %8 = vector.load %arg4[%c0_6, %c0_7] : memref<128x16xf32, #tpu.memory_space<vmem>>, vector<128x16xf32>
    %cst_8 = arith.constant dense<0.000000e+00> : vector<8x16xf32>
    %9 = tpu.matmul %7, %8, %cst_8 {dimension_numbers = #tpu.dot_dimension_numbers<[1], [0], [0], [1], [0, 0, 1, 1], [], []>} : vector<8x128xf32>, vector<128x16xf32>, vector<8x16xf32> -> vector<8x16xf32>
    %c0_9 = arith.constant 0 : index
    %c0_10 = arith.constant 0 : index
    %10 = vector.load %arg5[%c0_9, %c0_10] : memref<1x16xf32, #tpu.memory_space<vmem>>, vector<1x16xf32>
    %11 = vector.broadcast %10 : vector<1x16xf32> to vector<8x16xf32>
    %12 = arith.addf %9, %11 : vector<8x16xf32>
    %13 = arith.negf %12 : vector<8x16xf32>
    %14 = math.exp %13 : vector<8x16xf32>
    %cst_11 = arith.constant 1.000000e+00 : f32
    %15 = vector.broadcast %cst_11 : f32 to vector<8x16xf32>
    %16 = arith.addf %15, %14 : vector<8x16xf32>
    %17 = arith.divf %15, %16 : vector<8x16xf32>
    %c0_12 = arith.constant 0 : index
    %c0_13 = arith.constant 0 : index
    %18 = vector.load %arg6[%c0_12, %c0_13] : memref<8x16xf32, #tpu.memory_space<vmem>>, vector<8x16xf32>
    tpu.vector_store %arg6[%c0_12, %c0_13], %17 {strides = array<i32>} : memref<8x16xf32, #tpu.memory_space<vmem>>, vector<8x16xf32>,
    return
  }
  func.func @transform_0(%arg0: i32) -> (i32, i32) {
    %c0_i32 = arith.constant 0 : i32
    %c0_i32_0 = arith.constant 0 : i32
    return %arg0, %c0_i32 : i32, i32
  }
  func.func @transform_1(%arg0: i32) -> (i32, i32) {
    %c0_i32 = arith.constant 0 : i32
    %c0_i32_0 = arith.constant 0 : i32
    %c0_i32_1 = arith.constant 0 : i32
    return %c0_i32, %c0_i32_0 : i32, i32
  }
  func.func @transform_2(%arg0: i32) -> (i32, i32) {
    %c0_i32 = arith.constant 0 : i32
    %c0_i32_0 = arith.constant 0 : i32
    %c0_i32_1 = arith.constant 0 : i32
    return %c0_i32, %c0_i32_0 : i32, i32
  }
  func.func @transform_3(%arg0: i32) -> (i32, i32) {
    %c0_i32 = arith.constant 0 : i32
    %c0_i32_0 = arith.constant 0 : i32
    %c0_i32_1 = arith.constant 0 : i32
    return %c0_i32, %c0_i32_0 : i32, i32
  }
  func.func @transform_4(%arg0: i32) -> (i32, i32) {
    %c0_i32 = arith.constant 0 : i32
    %c0_i32_0 = arith.constant 0 : i32
    %c0_i32_1 = arith.constant 0 : i32
    return %c0_i32, %c0_i32_0 : i32, i32
  }
  func.func @transform_5(%arg0: i32) -> (i32, i32) {
    %c0_i32 = arith.constant 0 : i32
    %c0_i32_0 = arith.constant 0 : i32
    return %arg0, %c0_i32 : i32, i32
  }
}

</mosaic_0001>

<bundles_post_ra>
// kernel: reward_forward.1
= control target key start
LH: loop header
LB: loop body
LE: loop exit
PB: predicated region body
PF: predicated region fallthrough
CT: control target
= control target key end

     0   :  { %v324_v1 = vmov 0.0   ;;  %vm325_vm0 = vmmov 0   ;;  %vm33_vm1 = vcmask 261120   ;;  %s453_s0 = inlined_call_operand.vmem [shape: f32[8,32], index: 0, kind: input, shape index: {}]   ;;  %s454_s1 = inlined_call_operand.vmem [shape: f32[32,128], index: 1, kind: input, shape index: {}]   ;;  %s455_s2 = inlined_call_operand.vmem [shape: f32[1,128], index: 2, kind: input, shape index: {}]   ;;  %s456_s3 = inlined_call_operand.vmem [shape: f32[128,16], index: 3, kind: input, shape index: {}]   ;;  %s457_s4 = inlined_call_operand.vmem [shape: f32[1,16], index: 4, kind: input, shape index: {}]   ;;  %s458_s5 = inlined_call_operand.hbm [shape: f32[8,16], index: 5, kind: output, shape index: {}]  }
   0x1   :  { %v25_v0 = vld [vmem:[%s454_s1 + $0x18] sm:$0xff]  ;;  %249 = vmatprep.subr.mxu0 %v324_v1  ;;  %v24_v2 = vld [vmem:[%s454_s1 + $0x10] sm:$0xff]  ;;  %257 = vmatprep.mubr.msk.f32.mxu0 %vm325_vm0, %v324_v1  ;;  %v23_v5 = vld [vmem:[%s454_s1 + $0x8] sm:$0xff] }
   0x2   :  { %v123_v3 = vld [vmem:[%s456_s3 + $0x78] sm:$0xff]  ;;  %250 = vmatpush3.msra.mxu0 %v25_v0  ;;  %260 = vmatprep.subr.mxu1 %v324_v1  ;;  %v122_v4 = vld [vmem:[%s456_s3 + $0x70] sm:$0xff]  ;;  %v121_v6 = vld [vmem:[%s456_s3 + $0x68] sm:$0xff] }
   0x3   :  { %251 = vmatprep.subr.mxu0 %v324_v1  ;;  %261 = vmatpush3.msra.mxu1 %v123_v3  ;;  %v22_v7 = vld [vmem:[%s454_s1] sm:$0xff] }
   0x4   :  { %252 = vmatpush3.msra.mxu0 %v24_v2  ;;  %262 = vmatprep.subr.mxu1 %v324_v1  ;;  %v21_v8 = vld [vmem:[%s453_s0] sm:$0xff] }
   0x5   :  { %253 = vmatprep.subr.mxu0 %v324_v1  ;;  %263 = vmatpush3.msra.mxu1 %v122_v4  ;;  %v120_v9 = vld [vmem:[%s456_s3 + $0x60] sm:$0xff] }
   0x6   :  { %254 = vmatpush3.msra.mxu0 %v23_v5  ;;  %264 = vmatprep.subr.mxu1 %v324_v1 }
   0x7   :  { %10 = vsyncpa [#allocation3], 0  ;;  %255 = vmatprep.subr.mxu0 %v324_v1  ;;  %265 = vmatpush3.msra.mxu1 %v121_v6  ;;  %v119_v10 = vld [vmem:[%s456_s3 + $0x58] sm:$0xff]  ;;  %v118_v11 = vld [vmem:[%s456_s3 + $0x50] sm:$0xff]  ;;  %vm207_vm2 = vcmask 130048  }
   0x8   :  { %256 = vmatpush3.msra.mxu0 %v22_v7  ;;  %266 = vmatprep.subr.mxu1 %v324_v1  ;;  %v117_v12 = vld [vmem:[%s456_s3 + $0x48] sm:$0xff]  ;;  %v116_v13 = vld [vmem:[%s456_s3 + $0x40] sm:$0xff]  ;;  %v115_v14 = vld [vmem:[%s456_s3 + $0x38] sm:$0xff] }
   0x9   :  { %258 = vmatmul.mubr.msk.f32.vlgmr.msra.gmra.mxu0 %vm33_vm1, %v21_v8  ;;  %267 = vmatpush3.msra.mxu1 %v120_v9  ;;  %v114_v15 = vld [vmem:[%s456_s3 + $0x30] sm:$0xff]  ;;  %v113_v16 = vld [vmem:[%s456_s3 + $0x28] sm:$0xff]  ;;  %v112_v17 = vld [vmem:[%s456_s3 + $0x20] sm:$0xff] }
   0xa   :  { %268 = vmatprep.subr.mxu1 %v324_v1  ;;  %292 = vmatprep.mubr.msk.f32.mxu1 %vm325_vm0, %v324_v1  ;;  %v111_v18 = vld [vmem:[%s456_s3 + $0x18] sm:$0xff]  ;;  %v110_v19 = vld [vmem:[%s456_s3 + $0x10] sm:$0xff]  ;;  %v109_v20 = vld [vmem:[%s456_s3 + $0x8] sm:$0xff] }
   0xb   :  { %269 = vmatpush3.msra.mxu1 %v119_v10  ;;  %v108_v21 = vld [vmem:[%s456_s3] sm:$0xff]  ;;  %s326_s3 = smov [#allocation2]  }
   0xc   :  { %270 = vmatprep.subr.mxu1 %v324_v1  ;;  %v223_v22 = vld [vmem:[%s455_s2] ss:$0 sm:$0xff]  ;;  %s215_s11 = sshll.u32 %s326_s3, 4  ;;  %s216_s11 = int_to_ptr.vmem [resolvable:$true] %s215_s11 }
   0xd   :  { %271 = vmatpush3.msra.mxu1 %v118_v11  ;;  %v225_v27 = vld [vmem:[%s457_s4] ss:$0 sm:$0xff]  ;;  %s302_s2 = scalar_lea.vmem %s216_s11, 128  ;;  %p307_p1 = scmp.lt.s32.totalorder %s216_s11, %s216_s11 }
   0xe   :  { %272 = vmatprep.subr.mxu1 %v324_v1  ;;  %p303_p0 = scmp.ne.s32.totalorder %s216_s11, %s302_s2  ;;  %p308_p2 = scmp.lt.s32.totalorder %s302_s2, %s302_s2 }
   0xf   :  { %273 = vmatpush3.msra.mxu1 %v117_v12 }
  0x10   :  { %274 = vmatprep.subr.mxu1 %v324_v1  ;;  %p309_p3 = por %p308_p2, %p307_p1 }
  0x11   :  { %275 = vmatpush3.msra.mxu1 %v116_v13 }
  0x12   :  { %276 = vmatprep.subr.mxu1 %v324_v1  ;;  %p310_p4 = pnand %p309_p3, %p303_p0 }
  0x13   :  { %277 = vmatpush3.msra.mxu1 %v115_v14 }
  0x14   :  { %278 = vmatprep.subr.mxu1 %v324_v1 }
  0x15   :  { %279 = vmatpush3.msra.mxu1 %v114_v15 }
  0x16   :  { %280 = vmatprep.subr.mxu1 %v324_v1 }
  0x17   :  { %281 = vmatpush3.msra.mxu1 %v113_v16 }
  0x18   :  { %282 = vmatprep.subr.mxu1 %v324_v1 }
  0x19   :  { %283 = vmatpush3.msra.mxu1 %v112_v17 }
  0x1a   :  { %284 = vmatprep.subr.mxu1 %v324_v1 }
  0x1b   :  { %285 = vmatpush3.msra.mxu1 %v111_v18 }
  0x1c   :  { %286 = vmatprep.subr.mxu1 %v324_v1 }
  0x1d   :  { %287 = vmatpush3.msra.mxu1 %v110_v19 }
  0x1e   :  { %288 = vmatprep.subr.mxu1 %v324_v1 }
  0x1f   :  { %289 = vmatpush3.msra.mxu1 %v109_v20 }
  0x20   :  { %290 = vmatprep.subr.mxu1 %v324_v1 }
  0x21   :  { %291 = vmatpush3.msra.mxu1 %v108_v21 }
  0xc9   :  { %v103_v23 = vpop.f32.mrf.mxu0 }
  0xca   :  { %v104_v24 = vadd.f32 %v223_v22, %v103_v23 }
  0xcb   :  { %v259_v25 = vpop.f32.mrf.mxu0 }
  0xcc   :  { %v107_v26 = vmax.f32 %v104_v24, 0.0 }
  0xce   :  { %293 = vmatmul.mubr.f32.vlgmr.msra.gmra.mxu1 %v107_v26 }
 0x18e   :  { %v197_v28 = vpop.f32.mrf.mxu1 }
 0x18f   :  { %v198_v29 = vadd.f32 %v225_v27, %v197_v28 }
 0x190   :  { %v294_v30 = vpop.f32.mrf.mxu1 }
 0x191   :  { %v226_v31 = vmul.f32 -1.442695, %v198_v29 }
 0x193   :  { %298 = vpow2.f32 %v226_v31 }
 0x1a0   :  { %v299_v32 = vpop.eup %298 }
 0x1a1   :  { %v204_v33 = vadd.f32 1.0, %v299_v32 }
 0x1a3   :  { %300 = vrcp.f32 %v204_v33 }
 0x1b0   :  { %v301_v34 = vpop.eup %300 }
 0x1b1   :  { %208 = vst.msk [vmem:[#allocation2] sm:$0xff] %vm207_vm2, %v301_v34 }
 0x1b2   :  { %313 = shalt.err (!%p310_p4)
}
 0x1b3   :  { %218 = dma.vmem_to_hbm [thread:$0]  %s216_s11, 128, %s458_s5, [#allocation3]  }
 0x1b4   :  { %322 = dma.done.wait [#allocation3], 128  }
 0x1b5   :  { %323 = vsyncadd [#allocation3], 4294967168 }
 0x1b6   :  { %222 = vsyncpa [#allocation3], 1 }

</bundles_post_ra>
